<compile_context>
chip_gen: v6e
topology: v6e:2x2x1
jax: 0.10.0
libtpu: 0.0.40
codegen_flags: <defaults>
</compile_context>

<pallas_src>
import functools

import numpy as np
import jax
import jax.numpy as jnp
from jax.experimental import pallas as pl
from jax.experimental.pallas import tpu as pltpu

WINDOW_SIZE = 5
SIGMA = 1.5
C1 = 0.01 ** 2
C2 = 0.03 ** 2

# Use the single fused block-diagonal H-conv matmul when 5*H <= this
# (constant size (5H)^2 * 4 bytes stays well under the VMEM budget).
_FUSED_H_LIMIT = 1024


def _gaussian_1d(window_size: int, sigma: float) -> np.ndarray:
    x = np.arange(window_size, dtype=np.float64)
    g = np.exp(-((x - window_size // 2) ** 2) / (2.0 * sigma ** 2))
    g = g / g.sum()
    return g.astype(np.float32)


def _toeplitz(dim: int, g: np.ndarray) -> np.ndarray:
    """A[i, m] = g[m - i + pad] : (A @ z)[i, j] = sum_a g[a] * z_pad[i + a - pad, j]."""
    ws = g.shape[0]
    pad = ws // 2
    A = np.zeros((dim, dim), dtype=np.float32)
    for i in range(dim):
        for a in range(ws):
            m = i + a - pad
            if 0 <= m < dim:
                A[i, m] = g[a]
    return A


@functools.lru_cache(maxsize=None)
def _conv_constants(H: int, W: int, L: int, window_size: int, fuse_h: bool):
    """Host-side cached Toeplitz constants (numpy, read-only)."""
    g = _gaussian_1d(window_size, SIGMA)
    ah = _toeplitz(H, g)                           # (H, H)    row conv
    bw_t = _toeplitz(W, g).T                       # (W, W)    col conv (== Aw^T)
    LW = L * W
    bwl = np.zeros((LW, LW), dtype=np.float32)     # block-diag: no channel bleed
    for l in range(L):
        bwl[l * W:(l + 1) * W, l * W:(l + 1) * W] = bw_t
    if fuse_h:
        ahb = np.zeros((5 * H, 5 * H), dtype=np.float32)
        for s in range(5):
            ahb[s * H:(s + 1) * H, s * H:(s + 1) * H] = ah
        ah_out = ahb                               # (5H, 5H)  fused H conv
    else:
        ah_out = ah                                # (H, H)
    return ah_out, bwl


def _lp_ssim_kernel(x_ref, y_ref, ah_ref, bwl_ref, sq_ref, ssim_ref):
    x = x_ref[0].astype(jnp.float32)    # (H, LW)  lane-packed channels
    y = y_ref[0].astype(jnp.float32)    # (H, LW)
    H, LW = x.shape
    d = x - y

    # --- fused W-direction conv: ONE MXU matmul for all 5 statistics ----------
    z = jnp.concatenate([x, y, x * x, y * y, x * y], axis=0)         # (5H, LW)
    t = jnp.dot(z, bwl_ref[...], preferred_element_type=jnp.float32)  # (5H, LW)

    # --- H-direction conv ------------------------------------------------------
    if ah_ref.shape[0] == 5 * H:
        # Fused: single (5H, 5H) block-diagonal matmul; reshape splits the
        # sublane axis at multiples of H (no lane/sublane shuffle needed).
        c = jnp.dot(ah_ref[...], t, preferred_element_type=jnp.float32)  # (5H, LW)
        c = c.reshape(5, H, LW)
    else:
        # Fallback for very large H: batched (batch=5) dot_general with the
        # shared (H, H) Toeplitz.
        ah5 = jnp.broadcast_to(ah_ref[...], (5, H, H))
        c = jax.lax.dot_general(
            ah5, t.reshape(5, H, LW),
            dimension_numbers=(((2,), (1,)), ((0,), (0,))),
            preferred_element_type=jnp.float32)                          # (5, H, LW)

    mu1, mu2, s11, s22, s12 = c[0], c[1], c[2], c[3], c[4]

    mu1_sq = mu1 * mu1
    mu2_sq = mu2 * mu2
    mu1_mu2 = mu1 * mu2
    sigma1_sq = s11 - mu1_sq
    sigma2_sq = s22 - mu2_sq
    sigma12 = s12 - mu1_mu2

    num = (2.0 * mu1_mu2 + C1) * (2.0 * sigma12 + C2)
    den = (mu1_sq + mu2_sq + C1) * (sigma1_sq + sigma2_sq + C2)
    ssim_map = num * pl.reciprocal(den, approx=True)                  # EUP divide

    # Per-grid-step partials (no cross-step accumulation -> "parallel" grid axis).
    sq_ref[...] = jnp.sum(d * d, keepdims=True).reshape(1, 1, 1)
    ssim_ref[...] = jnp.sum(ssim_map, keepdims=True).reshape(1, 1, 1)


def lp_lssim_loss_weight(image_in, image_out, weight,
                         window_size=WINDOW_SIZE, size_average=True):
    """Pallas equivalent of LpLssimLossweight.forward (size_average=True)."""
    N, C, H, W = image_in.shape
    nc = N * C

    # Lane packing: put L channels side-by-side along the lane axis (L*W lanes).
    max_l = max(1, min(nc, 128 // W)) if W < 128 else 1
    L = 1
    for cand in range(max_l, 0, -1):
        if nc % cand == 0:
            L = cand
            break
    G = nc // L            # grid steps
    LW = L * W

    fuse_h = (5 * H) <= _FUSED_H_LIMIT
    ah_np, bwl_np = _conv_constants(H, W, L, window_size, fuse_h)
    ah = jnp.asarray(ah_np)             # (5H, 5H) or (H, H)
    bwl = jnp.asarray(bwl_np)           # (LW, LW)

    def pack(img):
        # (nc, H, W) -> (G, H, L*W): pack L channels along the lane axis.
        z = img.reshape(G, L, H, W)
        z = jnp.transpose(z, (0, 2, 1, 3))
        return z.reshape(G, H, LW)

    # Keep the original dtype: the kernel casts in-register (no extra HBM pass).
    x = pack(image_in.reshape(nc, H, W))
    y = pack(image_out.reshape(nc, H, W))

    sq_p, ssim_p = pl.pallas_call(
        _lp_ssim_kernel,
        out_shape=(
            jax.ShapeDtypeStruct((G, 1, 1), jnp.float32),
            jax.ShapeDtypeStruct((G, 1, 1), jnp.float32),
        ),
        grid_spec=pltpu.PrefetchScalarGridSpec(
            num_scalar_prefetch=0,
            grid=(G,),
            in_specs=[
                pl.BlockSpec((1, H, LW), lambda i: (i, 0, 0)),
                pl.BlockSpec((1, H, LW), lambda i: (i, 0, 0)),
                # Constant operands: index_map is grid-invariant, so they are
                # DMA'd into VMEM once and reused across all grid steps.
                pl.BlockSpec(ah.shape, lambda i: (0, 0)),
                pl.BlockSpec((LW, LW), lambda i: (0, 0)),
            ],
            out_specs=(
                pl.BlockSpec((1, 1, 1), lambda i: (i, 0, 0)),
                pl.BlockSpec((1, 1, 1), lambda i: (i, 0, 0)),
            ),
        ),
        compiler_params=pltpu.CompilerParams(
            dimension_semantics=("parallel",),   # per-step partials -> megacore-safe
        ),
    )(x, y, ah, bwl)

    sq_sum = jnp.sum(sq_p)
    ssim_sum = jnp.sum(ssim_p)

    lp = jnp.sqrt(sq_sum)
    # size_average=True -> mean over every element of ssim_map
    lssim = 1.0 - ssim_sum / jnp.float32(nc * H * W)
    # TODO(synk): size_average=False branch (per-batch mean) not wired; module default is True.
    lssim_w = lssim * weight
    return lp + lssim_w, lp, lssim_w


def _reference(image_in, image_out, weight, window_size=WINDOW_SIZE):
    """Pure-JAX reference (explicit zero-padded 5x5 correlation)."""
    N, C, H, W = image_in.shape
    g = _gaussian_1d(window_size, SIGMA)
    w2d = np.outer(g, g)
    pad = window_size // 2

    def conv(z):  # z: (N, C, H, W)
        zp = jnp.pad(z, ((0, 0), (0, 0), (pad, pad), (pad, pad)))
        out = jnp.zeros_like(z)
        for a in range(window_size):
            for b in range(window_size):
                out = out + w2d[a, b] * zp[:, :, a:a + H, b:b + W]
        return out

    x = image_in.astype(jnp.float32)
    y = image_out.astype(jnp.float32)
    mu1, mu2 = conv(x), conv(y)
    s1 = conv(x * x) - mu1 ** 2
    s2 = conv(y * y) - mu2 ** 2
    s12 = conv(x * y) - mu1 * mu2
    ssim_map = ((2 * mu1 * mu2 + C1) * (2 * s12 + C2)) / (
        (mu1 ** 2 + mu2 ** 2 + C1) * (s1 + s2 + C2))
    lp = jnp.sqrt(jnp.sum((x - y) ** 2))
    lssim = 1.0 - jnp.mean(ssim_map)
    return lp + lssim * weight, lp, lssim * weight


if __name__ == "__main__":
    key = jax.random.PRNGKey(0)
    k1, k2 = jax.random.split(key)
    shape = (2, 4, 16, 16)  # N, C, H, W
    image_in = jax.random.uniform(k1, shape, dtype=jnp.float32)
    image_out = jax.random.uniform(k2, shape, dtype=jnp.float32)
    weight = jnp.float32(0.5)

    total, lp, lssim_w = lp_lssim_loss_weight(image_in, image_out, weight)
    jax.block_until_ready((total, lp, lssim_w))

    ref_total, ref_lp, ref_lssim_w = _reference(image_in, image_out, weight)
    np.testing.assert_allclose(np.asarray(total), np.asarray(ref_total), rtol=2e-3, atol=2e-3)
    np.testing.assert_allclose(np.asarray(lp), np.asarray(ref_lp), rtol=2e-3, atol=2e-3)
    np.testing.assert_allclose(np.asarray(lssim_w), np.asarray(ref_lssim_w), rtol=2e-3, atol=2e-3)

    print("KERNEL_OK")
</pallas_src>

<mosaic_0001>
module attributes {stable_mosaic.version = 11 : i64} {
  func.func @_lp_ssim_kernel(%arg0: i32, %arg1: memref<1x16x128xf32, #tpu.memory_space<vmem>>, %arg2: memref<1x16x128xf32, #tpu.memory_space<vmem>>, %arg3: memref<80x80xf32, #tpu.memory_space<vmem>>, %arg4: memref<128x128xf32, #tpu.memory_space<vmem>>, %arg5: memref<1x1x1xf32, #tpu.memory_space<vmem>>, %arg6: memref<1x1x1xf32, #tpu.memory_space<vmem>>) attributes {dimension_semantics = [#tpu.dimension_semantics<parallel>], iteration_bounds = array<i64: 1>, scalar_prefetch = 0 : i64, scratch_operands = 0 : i64, tpu.core_type = #tpu.core_type<tc>, window_params = [{transform_indices = @transform_0, window_bounds = array<i64: 1, 16, 128>}, {transform_indices = @transform_1, window_bounds = array<i64: 1, 16, 128>}, {pipeline_mode = #tpu.pipeline_mode<synchronous>, transform_indices = @transform_2, window_bounds = array<i64: 80, 80>}, {pipeline_mode = #tpu.pipeline_mode<synchronous>, transform_indices = @transform_3, window_bounds = array<i64: 128, 128>}, {transform_indices = @transform_4, window_bounds = array<i64: 1, 1, 1>}, {transform_indices = @transform_5, window_bounds = array<i64: 1, 1, 1>}]} {
    %c0 = arith.constant 0 : index
    %c0_0 = arith.constant 0 : index
    %c0_1 = arith.constant 0 : index
    %0 = vector.load %arg1[%c0, %c0_0, %c0_1] : memref<1x16x128xf32, #tpu.memory_space<vmem>>, vector<1x16x128xf32>
    %1 = vector.shape_cast %0 : vector<1x16x128xf32> to vector<16x128xf32>
    %c0_2 = arith.constant 0 : index
    %c0_3 = arith.constant 0 : index
    %c0_4 = arith.constant 0 : index
    %2 = vector.load %arg2[%c0_2, %c0_3, %c0_4] : memref<1x16x128xf32, #tpu.memory_space<vmem>>, vector<1x16x128xf32>
    %3 = vector.shape_cast %2 : vector<1x16x128xf32> to vector<16x128xf32>
    %4 = arith.subf %1, %3 : vector<16x128xf32>
    %5 = arith.mulf %1, %1 : vector<16x128xf32>
    %6 = arith.mulf %3, %3 : vector<16x128xf32>
    %7 = arith.mulf %1, %3 : vector<16x128xf32>
    %8 = tpu.concatenate %1, %3, %5, %6, %7 in 0 : vector<16x128xf32>, vector<16x128xf32>, vector<16x128xf32>, vector<16x128xf32>, vector<16x128xf32> -> vector<80x128xf32>
    %c0_5 = arith.constant 0 : index
    %c0_6 = arith.constant 0 : index
    %9 = vector.load %arg4[%c0_5, %c0_6] : memref<128x128xf32, #tpu.memory_space<vmem>>, vector<128x128xf32>
    %cst = arith.constant dense<0.000000e+00> : vector<80x128xf32>
    %10 = tpu.matmul %8, %9, %cst {dimension_numbers = #tpu.dot_dimension_numbers<[1], [0], [0], [1], [0, 0, 1, 1], [], []>} : vector<80x128xf32>, vector<128x128xf32>, vector<80x128xf32> -> vector<80x128xf32>
    %c0_7 = arith.constant 0 : index
    %c0_8 = arith.constant 0 : index
    %11 = vector.load %arg3[%c0_7, %c0_8] : memref<80x80xf32, #tpu.memory_space<vmem>>, vector<80x80xf32>
    %cst_9 = arith.constant dense<0.000000e+00> : vector<80x128xf32>
    %12 = tpu.matmul %11, %10, %cst_9 {dimension_numbers = #tpu.dot_dimension_numbers<[1], [0], [0], [1], [0, 0, 1, 1], [], []>} : vector<80x80xf32>, vector<80x128xf32>, vector<80x128xf32> -> vector<80x128xf32>
    %13 = vector.shape_cast %12 : vector<80x128xf32> to vector<5x16x128xf32>
    %14 = vector.extract_strided_slice %13 {offsets = [0, 0, 0], sizes = [1, 16, 128], strides = [1, 1, 1]} : vector<5x16x128xf32> to vector<1x16x128xf32>
    %15 = vector.shape_cast %14 : vector<1x16x128xf32> to vector<16x128xf32>
    %16 = vector.extract_strided_slice %13 {offsets = [1, 0, 0], sizes = [1, 16, 128], strides = [1, 1, 1]} : vector<5x16x128xf32> to vector<1x16x128xf32>
    %17 = vector.shape_cast %16 : vector<1x16x128xf32> to vector<16x128xf32>
    %18 = vector.extract_strided_slice %13 {offsets = [2, 0, 0], sizes = [1, 16, 128], strides = [1, 1, 1]} : vector<5x16x128xf32> to vector<1x16x128xf32>
    %19 = vector.shape_cast %18 : vector<1x16x128xf32> to vector<16x128xf32>
    %20 = vector.extract_strided_slice %13 {offsets = [3, 0, 0], sizes = [1, 16, 128], strides = [1, 1, 1]} : vector<5x16x128xf32> to vector<1x16x128xf32>
    %21 = vector.shape_cast %20 : vector<1x16x128xf32> to vector<16x128xf32>
    %22 = vector.extract_strided_slice %13 {offsets = [4, 0, 0], sizes = [1, 16, 128], strides = [1, 1, 1]} : vector<5x16x128xf32> to vector<1x16x128xf32>
    %23 = vector.shape_cast %22 : vector<1x16x128xf32> to vector<16x128xf32>
    %24 = arith.mulf %15, %15 : vector<16x128xf32>
    %25 = arith.mulf %17, %17 : vector<16x128xf32>
    %26 = arith.mulf %15, %17 : vector<16x128xf32>
    %27 = arith.subf %19, %24 : vector<16x128xf32>
    %28 = arith.subf %21, %25 : vector<16x128xf32>
    %29 = arith.subf %23, %26 : vector<16x128xf32>
    %cst_10 = arith.constant 2.000000e+00 : f32
    %30 = vector.broadcast %cst_10 : f32 to vector<16x128xf32>
    %31 = arith.mulf %30, %26 : vector<16x128xf32>
    %cst_11 = arith.constant 9.99999974E-5 : f32
    %32 = vector.broadcast %cst_11 : f32 to vector<16x128xf32>
    %33 = arith.addf %31, %32 : vector<16x128xf32>
    %cst_12 = arith.constant 2.000000e+00 : f32
    %34 = vector.broadcast %cst_12 : f32 to vector<16x128xf32>
    %35 = arith.mulf %34, %29 : vector<16x128xf32>
    %cst_13 = arith.constant 8.99999984E-4 : f32
    %36 = vector.broadcast %cst_13 : f32 to vector<16x128xf32>
    %37 = arith.addf %35, %36 : vector<16x128xf32>
    %38 = arith.mulf %33, %37 : vector<16x128xf32>
    %39 = arith.addf %24, %25 : vector<16x128xf32>
    %cst_14 = arith.constant 9.99999974E-5 : f32
    %40 = vector.broadcast %cst_14 : f32 to vector<16x128xf32>
    %41 = arith.addf %39, %40 : vector<16x128xf32>
    %42 = arith.addf %27, %28 : vector<16x128xf32>
    %cst_15 = arith.constant 8.99999984E-4 : f32
    %43 = vector.broadcast %cst_15 : f32 to vector<16x128xf32>
    %44 = arith.addf %42, %43 : vector<16x128xf32>
    %45 = arith.mulf %41, %44 : vector<16x128xf32>
    %46 = tpu.reciprocal %45 {approx = true} : vector<16x128xf32> -> vector<16x128xf32>
    %47 = arith.mulf %38, %46 : vector<16x128xf32>
    %48 = arith.mulf %4, %4 : vector<16x128xf32>
    %49 = vector.shape_cast %48 : vector<16x128xf32> to vector<1x16x128xf32>
    %cst_16 = arith.constant dense<0.000000e+00> : vector<1xf32>
    %50 = vector.multi_reduction <add>, %49, %cst_16 [1, 2] : vector<1x16x128xf32> to vector<1xf32>
    %51 = vector.shape_cast %50 : vector<1xf32> to vector<1x1x1xf32>
    %52 = vector.extract %51[0, 0, 0] : f32 from vector<1x1x1xf32>
    %53 = vector.broadcast %52 : f32 to vector<1x1xf32>
    %54 = vector.shape_cast %53 : vector<1x1xf32> to vector<1x1x1xf32>
    %c0_17 = arith.constant 0 : index
    %c0_18 = arith.constant 0 : index
    %c0_19 = arith.constant 0 : index
    %55 = vector.load %arg5[%c0_17, %c0_18, %c0_19] : memref<1x1x1xf32, #tpu.memory_space<vmem>>, vector<1x1x1xf32>
    tpu.vector_store %arg5[%c0_17, %c0_18, %c0_19], %54 {strides = array<i32>} : memref<1x1x1xf32, #tpu.memory_space<vmem>>, vector<1x1x1xf32>,
    %56 = vector.shape_cast %47 : vector<16x128xf32> to vector<1x16x128xf32>
    %cst_20 = arith.constant dense<0.000000e+00> : vector<1xf32>
    %57 = vector.multi_reduction <add>, %56, %cst_20 [1, 2] : vector<1x16x128xf32> to vector<1xf32>
    %58 = vector.shape_cast %57 : vector<1xf32> to vector<1x1x1xf32>
    %59 = vector.extract %58[0, 0, 0] : f32 from vector<1x1x1xf32>
    %60 = vector.broadcast %59 : f32 to vector<1x1xf32>
    %61 = vector.shape_cast %60 : vector<1x1xf32> to vector<1x1x1xf32>
    %c0_21 = arith.constant 0 : index
    %c0_22 = arith.constant 0 : index
    %c0_23 = arith.constant 0 : index
    %62 = vector.load %arg6[%c0_21, %c0_22, %c0_23] : memref<1x1x1xf32, #tpu.memory_space<vmem>>, vector<1x1x1xf32>
    tpu.vector_store %arg6[%c0_21, %c0_22, %c0_23], %61 {strides = array<i32>} : memref<1x1x1xf32, #tpu.memory_space<vmem>>, vector<1x1x1xf32>,
    return
  }
  func.func @transform_0(%arg0: i32) -> (i32, i32, i32) {
    %c0_i32 = arith.constant 0 : i32
    %c0_i32_0 = arith.constant 0 : i32
    %c0_i32_1 = arith.constant 0 : i32
    return %arg0, %c0_i32, %c0_i32_0 : i32, i32, i32
  }
  func.func @transform_1(%arg0: i32) -> (i32, i32, i32) {
    %c0_i32 = arith.constant 0 : i32
    %c0_i32_0 = arith.constant 0 : i32
    %c0_i32_1 = arith.constant 0 : i32
    return %arg0, %c0_i32, %c0_i32_0 : i32, i32, i32
  }
  func.func @transform_2(%arg0: i32) -> (i32, i32) {
    %c0_i32 = arith.constant 0 : i32
    %c0_i32_0 = arith.constant 0 : i32
    %c0_i32_1 = arith.constant 0 : i32
    return %c0_i32, %c0_i32_0 : i32, i32
  }
  func.func @transform_3(%arg0: i32) -> (i32, i32) {
    %c0_i32 = arith.constant 0 : i32
    %c0_i32_0 = arith.constant 0 : i32
    %c0_i32_1 = arith.constant 0 : i32
    return %c0_i32, %c0_i32_0 : i32, i32
  }
  func.func @transform_4(%arg0: i32) -> (i32, i32, i32) {
    %c0_i32 = arith.constant 0 : i32
    %c0_i32_0 = arith.constant 0 : i32
    %c0_i32_1 = arith.constant 0 : i32
    return %arg0, %c0_i32, %c0_i32_0 : i32, i32, i32
  }
  func.func @transform_5(%arg0: i32) -> (i32, i32, i32) {
    %c0_i32 = arith.constant 0 : i32
    %c0_i32_0 = arith.constant 0 : i32
    %c0_i32_1 = arith.constant 0 : i32
    return %arg0, %c0_i32, %c0_i32_0 : i32, i32, i32
  }
}

</mosaic_0001>

<bundles_post_ra>
// kernel: tpu_custom_call.1
= control target key start
LH: loop header
LB: loop body
LE: loop exit
PB: predicated region body
PF: predicated region fallthrough
CT: control target
= control target key end

     0   :  { %11 = vsyncpa [#allocation3], 0  ;;  %s861_s0 = inlined_call_operand.hbm [shape: f32[1,16,128], index: 0, kind: input, shape index: {}]   ;;  %s862_s1 = inlined_call_operand.hbm [shape: f32[1,16,128], index: 1, kind: input, shape index: {}]   ;;  %s863_s2 = inlined_call_operand.hbm [shape: f32[80,80], index: 2, kind: input, shape index: {}]   ;;  %s864_s3 = inlined_call_operand.hbm [shape: f32[128,128], index: 3, kind: input, shape index: {}]   ;;  %s865_s4 = inlined_call_operand.hbm [shape: f32[1,1,1], index: 4, kind: output, shape index: {0}]   ;;  %s866_s5 = inlined_call_operand.hbm [shape: f32[1,1,1], index: 5, kind: output, shape index: {1}]  }
   0x1   :  { %12 = vsyncpa [#allocation6], 0 }
   0x2   :  { %13 = vsyncpa [#allocation9], 0 }
   0x3   :  { %14 = vsyncpa [#allocation4], 0 }
   0x4   :  { %15 = vsyncpa [#allocation12], 0  ;;  %s753_s18 = smov [#allocation5]   ;;  %s754_s20 = smov [#allocation2]  }
   0x5   :  { %s33_s19 = sshll.u32 %s753_s18, 4  ;;  %s21_s21 = sshll.u32 %s754_s20, 4  ;;  %s34_s19 = int_to_ptr.vmem [resolvable:$true] %s33_s19  ;;  %s22_s21 = int_to_ptr.vmem [resolvable:$true] %s21_s21 }
   0x6   :  { %s631_s22 = scalar_lea.vmem %s34_s19, 256  ;;  %p636_p1 = scmp.lt.s32.totalorder %s34_s19, %s34_s19 }
   0x7   :  { %p632_p0 = scmp.ne.s32.totalorder %s34_s19, %s631_s22  ;;  %p637_p2 = scmp.lt.s32.totalorder %s631_s22, %s631_s22 }
   0x9   :  { %p638_p3 = por %p637_p2, %p636_p1 }
   0xb   :  { %p639_p4 = pnand %p638_p3, %p632_p0 }
   0xd   :  { %642 = shalt.err (!%p639_p4)
}
   0xe   :  { %s755_s23 = smov 128   ;;  %s756_s24 = smov 8  }
   0xf   :  { %39 = dma.hbm_to_vmem [thread:$0]  %s862_s1, 256, %s34_s19, [#allocation6], %s755_s23, %s755_s23, %s756_s24  }
  0x10   :  { %s651_s27 = scalar_lea.vmem %s22_s21, 256  ;;  %p656_p6 = scmp.lt.s32.totalorder %s22_s21, %s22_s21 }
  0x11   :  { %p652_p5 = scmp.ne.s32.totalorder %s22_s21, %s651_s27  ;;  %p657_p7 = scmp.lt.s32.totalorder %s651_s27, %s651_s27 }
  0x13   :  { %p658_p8 = por %p657_p7, %p656_p6 }
  0x15   :  { %p659_p9 = pnand %p658_p8, %p652_p5 }
  0x17   :  { %662 = shalt.err (!%p659_p9)
}
  0x18   :  { %27 = dma.hbm_to_vmem [thread:$0]  %s861_s0, 256, %s22_s21, [#allocation3], %s755_s23, %s755_s23, %s756_s24  }
  0x19   :  { %s757_s30 = smov [#allocation7]   ;;  %s758_s7 = smov [#allocation8]  }
  0x1a   :  { %s45_s6 = sshll.u32 %s757_s30, 4  ;;  %s57_s8 = sshll.u32 %s758_s7, 4  ;;  %s46_s6 = int_to_ptr.vmem [resolvable:$true] %s45_s6  ;;  %s58_s8 = int_to_ptr.vmem [resolvable:$true] %s57_s8 }
  0x1b   :  { %s671_s1 = scalar_lea.vmem %s46_s6, 1280  ;;  %p676_p11 = scmp.lt.s32.totalorder %s46_s6, %s46_s6 }
  0x1c   :  { %p672_p10 = scmp.ne.s32.totalorder %s46_s6, %s671_s1  ;;  %p677_p12 = scmp.lt.s32.totalorder %s671_s1, %s671_s1 }
  0x1e   :  { %p678_p13 = por %p677_p12, %p676_p11 }
  0x20   :  { %p679_p0 = pnand %p678_p13, %p672_p10 }
  0x22   :  { %682 = shalt.err (!%p679_p0)
}
  0x23   :  { %51 = dma.hbm_to_vmem [thread:$0]  %s863_s2, 1280, %s46_s6, [#allocation6], %s755_s23, %s755_s23, %s756_s24  }
  0x24   :  { %s691_s0 = scalar_lea.vmem %s58_s8, 2048  ;;  %p696_p2 = scmp.lt.s32.totalorder %s58_s8, %s58_s8 }
  0x25   :  { %p692_p1 = scmp.ne.s32.totalorder %s58_s8, %s691_s0  ;;  %p697_p3 = scmp.lt.s32.totalorder %s691_s0, %s691_s0 }
  0x27   :  { %p698_p4 = por %p697_p3, %p696_p2 }
  0x29   :  { %p699_p5 = pnand %p698_p4, %p692_p1 }
  0x2b   :  { %702 = shalt.err (!%p699_p5)
}
  0x2c   :  { %63 = dma.hbm_to_vmem [thread:$0]  %s864_s3, 2048, %s58_s8, [#allocation9], %s755_s23, %s755_s23, %s756_s24  }
  0x2d   :  { %743 = dma.done.wait [#allocation3], 256  }
  0x2e   :  { %744 = vsyncadd [#allocation3], 4294967040 }
  0x2f   :  { %745 = dma.done.wait [#allocation6], 1536  }
  0x30   :  { %746 = vsyncadd [#allocation6], 4294965760 }
  0x31   :  { %747 = dma.done.wait [#allocation9], 2048  }
  0x32   :  { %748 = vsyncadd [#allocation9], 4294965248  ;;  %v103_v0 = vld [vmem:[#allocation8 + $0x78] sm:$0xff]  ;;  %v102_v1 = vld [vmem:[#allocation8 + $0x70] sm:$0xff]  ;;  %vm229_vm0 = vcmask 654336   ;;  %vm424_vm1 = vcmask 0  }
  0x33   :  { %525 = vmatprep.subr.mxu0 %v103_v0  ;;  %v101_v2 = vld [vmem:[#allocation8 + $0x68] sm:$0xff]  ;;  %v100_v3 = vld [vmem:[#allocation8 + $0x60] sm:$0xff]  ;;  %v815_v4 = vld [vmem:[#allocation2] sm:$0xff]  ;;  %s759_s3 = smov [#allocation10]  }
  0x34   :  { %526 = vmatpush3.msra.mxu0 %v103_v0  ;;  %v99_v5 = vld [vmem:[#allocation8 + $0x58] sm:$0xff]  ;;  %557 = vmatprep.mubr.f32.mxu0 %v815_v4  ;;  %v98_v6 = vld [vmem:[#allocation8 + $0x50] sm:$0xff]  ;;  %v97_v7 = vld [vmem:[#allocation8 + $0x48] sm:$0xff]  ;;  %v82_v20 = vmul.f32 %v815_v4, %v815_v4  ;;  %s444_s13 = sshll.u32 %s759_s3, 4  ;;  %s445_s13 = int_to_ptr.vmem [resolvable:$true] %s444_s13 }
  0x35   :  { %527 = vmatprep.subr.mxu0 %v102_v1  ;;  %v96_v8 = vld [vmem:[#allocation8 + $0x40] sm:$0xff]  ;;  %v95_v9 = vld [vmem:[#allocation8 + $0x38] sm:$0xff]  ;;  %v94_v10 = vld [vmem:[#allocation8 + $0x30] sm:$0xff]  ;;  %s703_s14 = scalar_lea.vmem %s445_s13, 16  ;;  %s707_s15 = scalar_lea.vmem %s445_s13, 32 }
  0x36   :  { %528 = vmatpush3.msra.mxu0 %v102_v1  ;;  %v93_v11 = vld [vmem:[#allocation8 + $0x28] sm:$0xff]  ;;  %v92_v12 = vld [vmem:[#allocation8 + $0x20] sm:$0xff]  ;;  %v91_v13 = vld [vmem:[#allocation8 + $0x18] sm:$0xff]  ;;  %p704_p6 = scmp.ne.s32.totalorder %s445_s13, %s703_s14  ;;  %p708_p7 = scmp.lt.s32.totalorder %s445_s13, %s445_s13 }
  0x37   :  { %529 = vmatprep.subr.mxu0 %v101_v2  ;;  %v90_v14 = vld [vmem:[#allocation8 + $0x10] sm:$0xff]  ;;  %v89_v15 = vld [vmem:[#allocation8 + $0x8] sm:$0xff]  ;;  %v88_v16 = vld [vmem:[#allocation8] sm:$0xff]  ;;  %p709_p8 = scmp.lt.s32.totalorder %s707_s15, %s703_s14 }
  0x38   :  { %530 = vmatpush3.msra.mxu0 %v101_v2  ;;  %v818_v17 = vld [vmem:[#allocation2 + $0x8] sm:$0xff]  ;;  %v820_v18 = vld [vmem:[#allocation5] sm:$0xff]  ;;  %v824_v19 = vld [vmem:[#allocation5 + $0x8] sm:$0xff] }
  0x39   :  { %531 = vmatprep.subr.mxu0 %v100_v3  ;;  %v83_v21 = vmul.f32 %v818_v17, %v818_v17  ;;  %v84_v22 = vmul.f32 %v820_v18, %v820_v18  ;;  %v85_v23 = vmul.f32 %v824_v19, %v824_v19  ;;  %v86_v24 = vmul.f32 %v820_v18, %v815_v4  ;;  %v219_v26 = vld [vmem:[#allocation7] sm:$0xff]  ;;  %v220_v37 = vld [vmem:[#allocation7 + $0x8] sm:$0xff]  ;;  %v221_v38 = vld [vmem:[#allocation7 + $0x10] sm:$0xff]  ;;  %p710_p9 = por %p709_p8, %p708_p7 }
  0x3a   :  { %532 = vmatpush3.msra.mxu0 %v100_v3  ;;  %v87_v25 = vmul.f32 %v824_v19, %v818_v17  ;;  %592 = vmatprep.mubr.msk.f32.mxu1 %vm229_vm0, %v219_v26  ;;  %v222_v39 = vld [vmem:[#allocation7 + $0x18] sm:$0xff]  ;;  %v223_v40 = vld [vmem:[#allocation7 + $0x20] sm:$0xff]  ;;  %v224_v41 = vld [vmem:[#allocation7 + $0x28] sm:$0xff]  ;;  %v80_v46 = vsub.f32 %v815_v4, %v820_v18  ;;  %v81_v47 = vsub.f32 %v818_v17, %v824_v19 }
  0x3b   :  { %533 = vmatprep.subr.mxu0 %v99_v5  ;;  %v225_v42 = vld [vmem:[#allocation7 + $0x30] sm:$0xff]  ;;  %v226_v43 = vld [vmem:[#allocation7 + $0x38] sm:$0xff]  ;;  %v227_v44 = vld [vmem:[#allocation7 + $0x40] sm:$0xff]  ;;  %p711_p10 = pnand %p710_p9, %p704_p6 }
  0x3c   :  { %534 = vmatpush3.msra.mxu0 %v99_v5  ;;  %v228_v45 = vld [vmem:[#allocation7 + $0x48] sm:$0xff]  ;;  %v411_v48 = vmul.f32 %v80_v46, %v80_v46  ;;  %v412_v49 = vmul.f32 %v81_v47, %v81_v47 }
  0x3d   :  { %535 = vmatprep.subr.mxu0 %v98_v6 }
  0x3e   :  { %536 = vmatpush3.msra.mxu0 %v98_v6  ;;  %v413_v50 = vadd.f32 %v412_v49, %v411_v48 }
  0x3f   :  { %537 = vmatprep.subr.mxu0 %v97_v7 }
  0x40   :  { %538 = vmatpush3.msra.mxu0 %v97_v7  ;;  %414 = vadd.xlane.f32.xlu0 %v413_v50 }
  0x41   :  { %539 = vmatprep.subr.mxu0 %v96_v8 }
  0x42   :  { %540 = vmatpush3.msra.mxu0 %v96_v8 }
  0x43   :  { %541 = vmatprep.subr.mxu0 %v95_v9 }
  0x44   :  { %542 = vmatpush3.msra.mxu0 %v95_v9 }
  0x45   :  { %543 = vmatprep.subr.mxu0 %v94_v10 }
  0x46   :  { %544 = vmatpush3.msra.mxu0 %v94_v10 }
  0x47   :  { %545 = vmatprep.subr.mxu0 %v93_v11 }
  0x48   :  { %546 = vmatpush3.msra.mxu0 %v93_v11 }
  0x49   :  { %547 = vmatprep.subr.mxu0 %v92_v12 }
  0x4a   :  { %548 = vmatpush3.msra.mxu0 %v92_v12 }
  0x4b   :  { %549 = vmatprep.subr.mxu0 %v91_v13 }
  0x4c   :  { %550 = vmatpush3.msra.mxu0 %v91_v13 }
  0x4d   :  { %551 = vmatprep.subr.mxu0 %v90_v14 }
  0x4e   :  { %552 = vmatpush3.msra.mxu0 %v90_v14 }
  0x4f   :  { %553 = vmatprep.subr.mxu0 %v89_v15 }
  0x50   :  { %554 = vmatpush3.msra.mxu0 %v89_v15 }
  0x51   :  { %555 = vmatprep.subr.mxu0 %v88_v16 }
  0x52   :  { %556 = vmatpush3.msra.mxu0 %v88_v16 }
  0x53   :  { %558 = vmatmul.mubr.f32.vlgmr.msra.gmra.mxu0 %v818_v17 }
  0x54   :  { %560 = vmatprep.mubr.f32.mxu0 %v820_v18 }
  0x57   :  { %561 = vmatmul.mubr.f32.gmra.mxu0 %v824_v19 }
  0x58   :  { %563 = vmatprep.mubr.f32.mxu0 %v82_v20 }
  0x5b   :  { %564 = vmatmul.mubr.f32.gmra.mxu0 %v83_v21 }
  0x5c   :  { %566 = vmatprep.mubr.f32.mxu0 %v84_v22 }
  0x5f   :  { %567 = vmatmul.mubr.f32.gmra.mxu0 %v85_v23 }
  0x60   :  { %569 = vmatprep.mubr.f32.mxu0 %v86_v24 }
  0x63   :  { %570 = vmatmul.mubr.f32.gmra.mxu0 %v87_v25 }
 0x113   :  { %v559_v27 = vpop.f32.mrf.mxu0 }
 0x115   :  { %v170_v28 = vpop.f32.mrf.mxu0 }
 0x117   :  { %v562_v29 = vpop.f32.mrf.mxu0 }
 0x119   :  { %v180_v30 = vpop.f32.mrf.mxu0 }
 0x11b   :  { %v565_v31 = vpop.f32.mrf.mxu0 }
 0x11d   :  { %v190_v32 = vpop.f32.mrf.mxu0 }
 0x11f   :  { %v568_v33 = vpop.f32.mrf.mxu0 }
 0x121   :  { %v200_v34 = vpop.f32.mrf.mxu0 }
 0x123   :  { %v571_v35 = vpop.f32.mrf.mxu0 }
 0x124   :  { %572 = vmatprep.subr.mxu1 %v571_v35 }
 0x125   :  { %v210_v36 = vpop.f32.mrf.mxu0  ;;  %573 = vmatpush3.msra.mxu1 %v571_v35 }
 0x126   :  { %574 = vmatprep.subr.mxu1 %v210_v36 }
 0x127   :  { %575 = vmatpush3.msra.mxu1 %v210_v36 }
 0x128   :  { %576 = vmatprep.subr.mxu1 %v568_v33 }
 0x129   :  { %577 = vmatpush3.msra.mxu1 %v568_v33 }
 0x12a   :  { %578 = vmatprep.subr.mxu1 %v200_v34 }
 0x12b   :  { %579 = vmatpush3.msra.mxu1 %v200_v34  ;;  %v415_v34 = vpop.xlane.xlu0 %414 }
 0x12c   :  { %580 = vmatprep.subr.mxu1 %v565_v31  ;;  %v416_v35 = vrot.slane %v415_v34, 4 }
 0x12d   :  { %581 = vmatpush3.msra.mxu1 %v565_v31 }
 0x12e   :  { %582 = vmatprep.subr.mxu1 %v190_v32  ;;  %v417_v36 = vadd.f32 %v416_v35, %v415_v34 }
 0x12f   :  { %583 = vmatpush3.msra.mxu1 %v190_v32 }
 0x130   :  { %584 = vmatprep.subr.mxu1 %v562_v29 }
 0x131   :  { %585 = vmatpush3.msra.mxu1 %v562_v29 }
 0x132   :  { %586 = vmatprep.subr.mxu1 %v180_v30 }
 0x133   :  { %587 = vmatpush3.msra.mxu1 %v180_v30 }
 0x134   :  { %588 = vmatprep.subr.mxu1 %v559_v27 }
 0x135   :  { %589 = vmatpush3.msra.mxu1 %v559_v27 }
 0x136   :  { %590 = vmatprep.subr.mxu1 %v170_v28 }
 0x137   :  { %591 = vmatpush3.msra.mxu1 %v170_v28 }
 0x138   :  { %593 = vmatmul.mubr.msk.f32.vlgmr.msra.gmra.mxu1 %vm229_vm0, %v220_v37  ;;  %v418_v37 = vrot.slane %v417_v36, 2 }
 0x139   :  { %595 = vmatprep.mubr.msk.f32.mxu1 %vm229_vm0, %v221_v38 }
 0x13a   :  { %v419_v38 = vadd.f32 %v418_v37, %v417_v36 }
 0x13c   :  { %596 = vmatmul.mubr.msk.f32.gmra.mxu1 %vm229_vm0, %v222_v39  ;;  %v420_v39 = vrot.slane %v419_v38, 1 }
 0x13d   :  { %598 = vmatprep.mubr.msk.f32.mxu1 %vm229_vm0, %v223_v40 }
 0x13e   :  { %v421_v40 = vadd.f32 %v420_v39, %v419_v38 }
 0x140   :  { %599 = vmatmul.mubr.msk.f32.gmra.mxu1 %vm229_vm0, %v224_v41  ;;  %607 = vpush %v421_v40 }
 0x141   :  { %601 = vmatprep.mubr.msk.f32.mxu1 %vm229_vm0, %v225_v42 }
 0x144   :  { %602 = vmatmul.mubr.msk.f32.gmra.mxu1 %vm229_vm0, %v226_v43 }
 0x145   :  { %604 = vmatprep.mubr.msk.f32.mxu1 %vm229_vm0, %v227_v44 }
 0x148   :  { %605 = vmatmul.mubr.msk.f32.gmra.mxu1 %vm229_vm0, %v228_v45 }
 0x171   :  { %s608_s2 = spop %607 }
 0x172   :  { %v423_v41 = vstv %s608_s2 }
 0x173   :  { %425 = vst.msk [vmem:[#allocation10] sm:$0x1] %vm424_vm1, %v423_v41 }
 0x1f8   :  { %v594_v51 = vpop.f32.mrf.mxu1 }
 0x1f9   :  { %v376_v58 = vmul.f32 %v594_v51, %v594_v51 }
 0x1fa   :  { %v326_v52 = vpop.f32.mrf.mxu1 }
 0x1fb   :  { %v375_v61 = vmul.f32 %v326_v52, %v326_v52 }
 0x1fc   :  { %v597_v53 = vpop.f32.mrf.mxu1 }
 0x1fd   :  { %v378_v56 = vmul.f32 %v597_v53, %v597_v53  ;;  %v380_v14 = vmul.f32 %v597_v53, %v594_v51 }
 0x1fe   :  { %v336_v54 = vpop.f32.mrf.mxu1 }
 0x1ff   :  { %v377_v59 = vmul.f32 %v336_v54, %v336_v54  ;;  %v398_v62 = vadd.f32 %v378_v56, %v376_v58  ;;  %v379_v15 = vmul.f32 %v336_v54, %v326_v52  ;;  %v388_v21 = vmul.f32 2.0, %v380_v14 }
 0x200   :  { %v600_v55 = vpop.f32.mrf.mxu1 }
 0x201   :  { %v382_v63 = vsub.f32 %v600_v55, %v376_v58  ;;  %v397_v2 = vadd.f32 %v377_v59, %v375_v61  ;;  %v400_v7 = vadd.f32 0.0001, %v398_v62  ;;  %v387_v22 = vmul.f32 2.0, %v379_v15 }
 0x202   :  { %v346_v57 = vpop.f32.mrf.mxu1  ;;  %v390_v25 = vadd.f32 0.0001, %v388_v21 }
 0x203   :  { %v381_v3 = vsub.f32 %v346_v57, %v375_v61  ;;  %v399_v10 = vadd.f32 0.0001, %v397_v2  ;;  %v389_v26 = vadd.f32 0.0001, %v387_v22 }
 0x204   :  { %v603_v60 = vpop.f32.mrf.mxu1 }
 0x205   :  { %v384_v0 = vsub.f32 %v603_v60, %v378_v56 }
 0x206   :  { %v356_v1 = vpop.f32.mrf.mxu1 }
 0x207   :  { %v402_v4 = vadd.f32 %v384_v0, %v382_v63  ;;  %v383_v5 = vsub.f32 %v356_v1, %v377_v59 }
 0x208   :  { %v606_v6 = vpop.f32.mrf.mxu1 }
 0x209   :  { %v404_v8 = vadd.f32 0.0009, %v402_v4  ;;  %v401_v9 = vadd.f32 %v383_v5, %v381_v3  ;;  %v386_v17 = vsub.f32 %v606_v6, %v380_v14 }
 0x20a   :  { %v366_v13 = vpop.f32.mrf.mxu1 }
 0x20b   :  { %v406_v11 = vmul.f32 %v404_v8, %v400_v7  ;;  %v403_v12 = vadd.f32 0.0009, %v401_v9  ;;  %v385_v18 = vsub.f32 %v366_v13, %v379_v15  ;;  %v392_v19 = vmul.f32 2.0, %v386_v17 }
 0x20d   :  { %619 = vrcp.f32 %v406_v11  ;;  %v405_v16 = vmul.f32 %v403_v12, %v399_v10  ;;  %v391_v20 = vmul.f32 2.0, %v385_v18  ;;  %v394_v23 = vadd.f32 0.0009, %v392_v19 }
 0x20f   :  { %621 = vrcp.f32 %v405_v16  ;;  %v393_v24 = vadd.f32 0.0009, %v391_v20  ;;  %v396_v28 = vmul.f32 %v394_v23, %v390_v25 }
 0x211   :  { %v395_v29 = vmul.f32 %v393_v24, %v389_v26 }
 0x21a   :  { %v620_v27 = vpop.eup %619 }
 0x21b   :  { %v410_v32 = vmul.f32 %v620_v27, %v396_v28 }
 0x21c   :  { %v622_v30 = vpop.eup %621 }
 0x21d   :  { %v409_v31 = vmul.f32 %v622_v30, %v395_v29 }
 0x21f   :  { %v426_v33 = vadd.f32 %v410_v32, %v409_v31 }
 0x221   :  { %427 = vadd.xlane.f32.xlu0 %v426_v33 }
 0x222   :  { %714 = shalt.err (!%p711_p10)
}
 0x223   :  { %447 = dma.vmem_to_hbm [thread:$0]  %s445_s13, 16, %s865_s4, [#allocation4]  }
 0x224   :  { %s760_s18 = smov [#allocation11]  }
 0x225   :  { %s454_s19 = sshll.u32 %s760_s18, 4  ;;  %s455_s19 = int_to_ptr.vmem [resolvable:$true] %s454_s19 }
 0x226   :  { %s723_s21 = scalar_lea.vmem %s455_s19, 16  ;;  %s727_s22 = scalar_lea.vmem %s455_s19, 32 }
 0x227   :  { %p724_p11 = scmp.ne.s32.totalorder %s455_s19, %s723_s21  ;;  %p728_p12 = scmp.lt.s32.totalorder %s455_s19, %s455_s19 }
 0x228   :  { %p729_p13 = scmp.lt.s32.totalorder %s727_s22, %s723_s21 }
 0x22a   :  { %p730_p0 = por %p729_p13, %p728_p12 }
 0x22c   :  { %p731_p1 = pnand %p730_p0, %p724_p11 }
 0x2aa   :  { %v428_v42 = vpop.xlane.xlu0 %427 }
 0x2ab   :  { %v429_v43 = vrot.slane %v428_v42, 4 }
 0x2ad   :  { %v430_v44 = vadd.f32 %v429_v43, %v428_v42 }
 0x2af   :  { %v431_v45 = vrot.slane %v430_v44, 2 }
 0x2b1   :  { %v432_v46 = vadd.f32 %v431_v45, %v430_v44 }
 0x2b3   :  { %v433_v47 = vrot.slane %v432_v46, 1 }
 0x2b5   :  { %v434_v48 = vadd.f32 %v433_v47, %v432_v46 }
 0x2b7   :  { %609 = vpush %v434_v48 }
 0x2e8   :  { %s610_s20 = spop %609 }
 0x2e9   :  { %v436_v49 = vstv %s610_s20 }
 0x2ea   :  { %437 = vst.msk [vmem:[#allocation11] sm:$0x1] %vm424_vm1, %v436_v49 }
 0x2eb   :  { %734 = shalt.err (!%p731_p1)
}
 0x2ec   :  { %457 = dma.vmem_to_hbm [thread:$0]  %s455_s19, 16, %s866_s5, [#allocation12]  }
 0x2ed   :  { %749 = dma.done.wait [#allocation4], 16  }
 0x2ee   :  { %750 = vsyncadd [#allocation4], 4294967280 }
 0x2ef   :  { %751 = dma.done.wait [#allocation12], 16  }
 0x2f0   :  { %752 = vsyncadd [#allocation12], 4294967280 }
 0x2f1   :  { %464 = vsyncpa [#allocation3], 1 }
 0x2f2   :  { %465 = vsyncpa [#allocation6], 1 }
 0x2f3   :  { %466 = vsyncpa [#allocation9], 1 }
 0x2f4   :  { %467 = vsyncpa [#allocation4], 1 }
 0x2f5   :  { %468 = vsyncpa [#allocation12], 1 }

</bundles_post_ra>
